<compile_context>
chip_gen: v5e
topology: v5e:2x2
jax: 0.10.0
libtpu: 0.0.40
codegen_flags: <defaults>
</compile_context>

<pallas_src>
import functools

import jax
import jax.numpy as jnp
from jax import lax
from jax.experimental import pallas as pl
from jax.experimental.pallas import tpu as pltpu


# ----------------------------------------------------------------------------
# pltpu.roll convention probe (cached, runs one tiny kernel once).
# We need rolled[k] == x[k + s]; pin the rotation direction at runtime so the
# shifted-neighbor indexing is robust across jax/Mosaic versions.
# ----------------------------------------------------------------------------
def _roll_probe_kernel(x_ref, o_ref):
    o_ref[...] = pltpu.roll(x_ref[...], 1, axis=1)


@functools.lru_cache(maxsize=None)
def _roll_matches_numpy():
    """True iff pltpu.roll follows np.roll convention (roll(x, 1)[0] == x[-1])."""
    x = lax.broadcasted_iota(jnp.float32, (8, 128), 1)
    out = pl.pallas_call(
        _roll_probe_kernel,
        out_shape=jax.ShapeDtypeStruct((8, 128), jnp.float32),
    )(x)
    return bool(out[0, 0] == 127.0)


# ----------------------------------------------------------------------------
# Kernels
# ----------------------------------------------------------------------------
def _tv_diff(x_ref, *, p, eps, H, W, shift_right, shift_down):
    """Per-image squared-gradient map in the flattened (C, H*W) layout."""
    x = x_ref[0].astype(jnp.float32)                      # (C, H*W), cast in-kernel
    # Shifted neighbors via XLU rotations (no relayout-inducing offset slices).
    right = pltpu.roll(x, shift_right, axis=1)            # right[:, k] == x[:, k+1]
    down = pltpu.roll(x, shift_down, axis=1)              # down[:, k]  == x[:, k+W]

    col = lax.broadcasted_iota(jnp.int32, x.shape, 1)     # flat pixel index
    if (W & (W - 1)) == 0:                                # power-of-two fast path
        col_in_row = jnp.bitwise_and(col, W - 1)
    else:
        col_in_row = col % W

    # Replicate padding makes the boundary diffs exactly zero.
    x_diff = jnp.where(col_in_row != (W - 1), x - right, 0.0)   # last column -> 0
    y_diff = jnp.where(col < (H - 1) * W, x - down, 0.0)        # last row    -> 0
    diff = x_diff * x_diff + y_diff * y_diff              # (C, H*W)

    if p == 1:
        # Vectorial TV norm: channel mean + sqrt -> (1, H*W).
        diff = jnp.sqrt(jnp.mean(diff + eps, axis=0, keepdims=True))
    return diff


def _tv_map_kernel(x_ref, o_ref, *, p, eps, H, W, shift_right, shift_down):
    # reduction == 'none': write the lane-dense per-pixel map for this image.
    o_ref[0] = _tv_diff(x_ref, p=p, eps=eps, H=H, W=W,
                        shift_right=shift_right, shift_down=shift_down)


def _tv_reduce_kernel(x_ref, o_ref, acc_ref, *, p, eps, H, W,
                      shift_right, shift_down, scale):
    # reduction in ('mean', 'sum'): accumulate lane-wise partial sums in VMEM
    # scratch across the N grid steps; emit a single SMEM scalar at the end.
    diff = _tv_diff(x_ref, p=p, eps=eps, H=H, W=W,
                    shift_right=shift_right, shift_down=shift_down)
    n = pl.program_id(0)

    @pl.when(n == 0)
    def _init():
        acc_ref[...] = jnp.zeros_like(acc_ref)

    acc_ref[...] += jnp.sum(diff, axis=0, keepdims=True)  # (1, H*W) partials

    @pl.when(n == pl.num_programs(0) - 1)
    def _finalize():
        total = jnp.sum(acc_ref[...])
        if scale != 1.0:          # 'mean': divide the raw running sum once, at the end
            total = total * scale
        o_ref[0, 0] = total


# ----------------------------------------------------------------------------
# Wrapper
# ----------------------------------------------------------------------------
def tv_loss(x, p=1, reduction='mean', eps=1e-8):
    """Pallas TPU implementation of TVLoss.forward (the `target` arg of the
    PyTorch module is ignored there, so it is omitted here)."""
    if p not in (1, 2):
        raise ValueError('p must be 1 or 2')
    if reduction not in ('mean', 'sum', 'none'):
        raise ValueError("reduction must be 'mean', 'sum', or 'none'")

    N, C, H, W = x.shape
    HW = H * W
    out_c = 1 if p == 1 else C

    # Free, row-major reshape to a lane-dense view; input stays in native dtype.
    x_flat = x.reshape(N, C, HW)

    # pltpu.roll shifts that place element k+1 / k+W at position k.
    if _roll_matches_numpy():
        shift_right, shift_down = (HW - 1) % HW, (HW - W) % HW
    else:
        shift_right, shift_down = 1 % HW, W % HW

    common = dict(p=p, eps=eps, H=H, W=W,
                  shift_right=shift_right, shift_down=shift_down)
    in_spec = pl.BlockSpec((1, C, HW), lambda n: (n, 0, 0))

    if reduction == 'none':
        out = pl.pallas_call(
            functools.partial(_tv_map_kernel, **common),
            out_shape=jax.ShapeDtypeStruct((N, out_c, HW), jnp.float32),
            grid=(N,),
            in_specs=[in_spec],
            out_specs=pl.BlockSpec((1, out_c, HW), lambda n: (n, 0, 0)),
            compiler_params=pltpu.CompilerParams(
                dimension_semantics=("parallel",)),
        )(x_flat)
        return out.reshape(N, out_c, H, W)

    scale = 1.0 if reduction == 'sum' else 1.0 / float(N * out_c * HW)
    out = pl.pallas_call(
        functools.partial(_tv_reduce_kernel, scale=scale, **common),
        out_shape=jax.ShapeDtypeStruct((1, 1), jnp.float32),
        grid=(N,),
        in_specs=[in_spec],
        # Scalar result lives in SMEM; the grid axis accumulates, so it must be
        # sequential ("arbitrary").
        out_specs=pl.BlockSpec(memory_space=pltpu.MemorySpace.SMEM),
        scratch_shapes=[pltpu.VMEM((1, HW), jnp.float32)],
        compiler_params=pltpu.CompilerParams(
            dimension_semantics=("arbitrary",)),
    )(x_flat)
    return out[0, 0]


# ----------------------------------------------------------------------------
# Pure-JAX reference mirroring the PyTorch forward exactly.
# ----------------------------------------------------------------------------
def tv_loss_ref(x, p=1, reduction='mean', eps=1e-8):
    xf = x.astype(jnp.float32)
    xp = jnp.pad(xf, ((0, 0), (0, 0), (0, 1), (0, 1)), mode='edge')
    x_diff = xp[..., :-1, :-1] - xp[..., :-1, 1:]
    y_diff = xp[..., :-1, :-1] - xp[..., 1:, :-1]
    diff = x_diff ** 2 + y_diff ** 2
    if p == 1:
        diff = jnp.sqrt((diff + eps).mean(axis=1, keepdims=True))
    if reduction == 'mean':
        return diff.mean()
    if reduction == 'sum':
        return diff.sum()
    return diff


if __name__ == "__main__":
    key = jax.random.PRNGKey(0)
    x = jax.random.normal(key, (2, 4, 16, 16), dtype=jnp.float32)

    # p=1, reduction='mean' (vectorial TV norm, default reduction)
    out = jax.block_until_ready(tv_loss(x, p=1, reduction='mean'))
    ref = tv_loss_ref(x, p=1, reduction='mean')
    assert jnp.allclose(out, ref, rtol=1e-5, atol=1e-6)

    # p=2, reduction='sum'
    out = jax.block_until_ready(tv_loss(x, p=2, reduction='sum'))
    ref = tv_loss_ref(x, p=2, reduction='sum')
    assert jnp.allclose(out, ref, rtol=1e-5, atol=1e-4)

    # p=1, reduction='none' (per-pixel map, shape (N, 1, H, W))
    out = jax.block_until_ready(tv_loss(x, p=1, reduction='none'))
    ref = tv_loss_ref(x, p=1, reduction='none')
    assert out.shape == (2, 1, 16, 16)
    assert jnp.allclose(out, ref, rtol=1e-5, atol=1e-6)

    # p=2, reduction='none' (per-pixel map, shape (N, C, H, W))
    out = jax.block_until_ready(tv_loss(x, p=2, reduction='none'))
    ref = tv_loss_ref(x, p=2, reduction='none')
    assert out.shape == (2, 4, 16, 16)
    assert jnp.allclose(out, ref, rtol=1e-5, atol=1e-6)

    # Native bf16 input: DMA'd narrow, cast to f32 inside the kernel.
    xb = x.astype(jnp.bfloat16)
    out = jax.block_until_ready(tv_loss(xb, p=1, reduction='mean'))
    ref = tv_loss_ref(xb, p=1, reduction='mean')
    assert jnp.allclose(out, ref, rtol=1e-5, atol=1e-6)

    print("KERNEL_OK")
</pallas_src>

<mosaic_0001>
module attributes {stable_mosaic.version = 11 : i64} {
  func.func @_roll_probe_kernel(%arg0: memref<8x128xf32, #tpu.memory_space<vmem>>, %arg1: memref<8x128xf32, #tpu.memory_space<vmem>>) attributes {dimension_semantics = [], scalar_prefetch = 0 : i64, scratch_operands = 0 : i64, tpu.core_type = #tpu.core_type<tc>} {
    %c0 = arith.constant 0 : index
    %c0_0 = arith.constant 0 : index
    %0 = vector.load %arg0[%c0, %c0_0] : memref<8x128xf32, #tpu.memory_space<vmem>>, vector<8x128xf32>
    %c1_i32 = arith.constant 1 : i32
    %1 = tpu.dynamic_rotate %0 by %c1_i32 dim 1 : vector<8x128xf32>, i32 -> vector<8x128xf32>
    %c0_1 = arith.constant 0 : index
    %c0_2 = arith.constant 0 : index
    %2 = vector.load %arg1[%c0_1, %c0_2] : memref<8x128xf32, #tpu.memory_space<vmem>>, vector<8x128xf32>
    tpu.vector_store %arg1[%c0_1, %c0_2], %1 {strides = array<i32>} : memref<8x128xf32, #tpu.memory_space<vmem>>, vector<8x128xf32>,
    return
  }
}

</mosaic_0001>

<bundles_post_ra>
// kernel: tpu_custom_call.1
= control target key start
LH: loop header
LB: loop body
LE: loop exit
PB: predicated region body
PF: predicated region fallthrough
CT: control target
= control target key end

     0   :  { %6 = vsyncpa [#allocation3], 0  ;;  %s118_s0 = inlined_call_operand.hbm [shape: f32[8,128], index: 0, kind: input, shape index: {}]   ;;  %s119_s1 = inlined_call_operand.hbm [shape: f32[8,128], index: 1, kind: output, shape index: {}]  }
   0x1   :  { %7 = vsyncpa [#allocation4], 0  ;;  %s13_s8 = sshll.u32 %s118_s0, 4  ;;  %s99_s9 = smov [#allocation2]   ;;  %s14_s8 = int_to_ptr.hbm [resolvable:$true] %s13_s8 }
   0x2   :  { %s15_s10 = sshll.u32 %s99_s9, 4  ;;  %s16_s10 = int_to_ptr.vmem [resolvable:$true] %s15_s10 }
   0x3   :  { %18 = dma.hbm_to_vmem [thread:$0]  %s14_s8, 128, %s16_s10, [#allocation3]  }
   0x4   :  { %95 = dma.done.wait [#allocation3], 128  }
   0x5   :  { %96 = vsyncadd [#allocation3], 4294967168  ;;  %v23_v0 = vld [vmem:[#allocation2] sm:$0xff]  ;;  %s100_s11 = smov 1   ;;  %s101_s12 = smov [#allocation5]  }
   0x6   :  { %24 = vrot.lane.b32.xlu0 %v23_v0, %s100_s11  ;;  %s32_s13 = sshll.u32 %s101_s12, 4  ;;  %s34_s16 = sshll.u32 %s119_s1, 4  ;;  %s33_s13 = int_to_ptr.vmem [resolvable:$true] %s32_s13  ;;  %s35_s16 = int_to_ptr.hbm [resolvable:$true] %s34_s16 }
  0x78   :  { %v25_v1 = vpop.permute.xlu0 %24 }
  0x79   :  { %26 = vst [vmem:[#allocation5] sm:$0xff] %v25_v1 }
  0x7a   :  { %37 = dma.vmem_to_hbm [thread:$0]  %s33_s13, 128, %s35_s16, [#allocation4]  }
  0x7b   :  { %97 = dma.done.wait [#allocation4], 128  }
  0x7c   :  { %98 = vsyncadd [#allocation4], 4294967168 }
  0x7d   :  { %42 = vsyncpa [#allocation3], 1 }
  0x7e   :  { %43 = vsyncpa [#allocation4], 1 }

</bundles_post_ra>
